<compile_context>
chip_gen: v7x
topology: tpu7x:2x2x1
jax: 0.10.0
libtpu: 0.0.40
codegen_flags: <defaults>
</compile_context>

<pallas_src>
import jax
import jax.numpy as jnp
from jax import lax
from jax.experimental import pallas as pl
from jax.experimental.pallas import tpu as pltpu

_EPS = 1e-8  # PyTorch CosineSimilarity default eps


def _round_up(a: int, b: int) -> int:
    return ((a + b - 1) // b) * b


def _make_cos_sim_kernel(temp: float):
    inv_temp = 1.0 / float(temp)
    eps_sq = _EPS * _EPS

    def cos_sim_kernel(x_ref, y_ref, o_ref):
        x = x_ref[...]                               # (tm, H) native dtype
        y = y_ref[...]                               # (tn, H) native dtype
        xf = x.astype(jnp.float32)
        yf = y.astype(jnp.float32)

        # 1/max(||row||, eps) == rsqrt(max(sum(row^2), eps^2)); rsqrt -> EUP.
        x_scale = inv_temp * lax.rsqrt(
            jnp.maximum(jnp.sum(xf * xf, axis=-1, keepdims=True), eps_sq))  # (tm,1)
        y_scale = lax.rsqrt(
            jnp.maximum(jnp.sum(yf * yf, axis=-1, keepdims=True), eps_sq))  # (tn,1)

        # Pre-scale operands; cast back to native dtype so bf16 inputs keep
        # bf16 MXU throughput (f32 accumulation via preferred_element_type).
        xs = (xf * x_scale).astype(x.dtype)
        ys = (yf * y_scale).astype(y.dtype)

        # Contract last dims directly (no y.T) -> (tm, tn) on the MXU.
        o_ref[...] = lax.dot_general(
            xs, ys,
            dimension_numbers=(((1,), (1,)), ((), ())),
            preferred_element_type=jnp.float32,
        ).astype(o_ref.dtype)

    return cos_sim_kernel


def similarity(x, y, temp, *, tm_max: int = 512, tn_max: int = 512):
    """Pallas equivalent of Similarity(temp)(x, y).

    Accepts either:
      x: (N, H),    y: (M, H)          -> (N, M)
      x: (N, 1, H), y: (1, M, H)       -> (N, M)   (the SimCSE usage)
    """
    if x.ndim == 3:
        assert x.shape[1] == 1 and y.shape[0] == 1 and x.shape[-1] == y.shape[-1]
        x = x.reshape(x.shape[0], x.shape[-1])
        y = y.reshape(y.shape[1], y.shape[-1])
    N, H = x.shape
    M, Hy = y.shape
    assert H == Hy

    # Shrink row tiles if H is very large so that (2 inputs x 2 buffers x tile)
    # plus the output tile stays comfortably inside the scoped VMEM on every
    # chip generation (v7x has only 64 MiB total VMEM per TC).
    bytes_per = jnp.dtype(x.dtype).itemsize
    budget = 12 * 1024 * 1024  # per-operand tile budget (double-buffered -> 4x)
    rows_cap = max(128, (budget // max(1, H * bytes_per)) // 128 * 128)
    tm_max = min(tm_max, rows_cap)
    tn_max = min(tn_max, rows_cap)

    # (8,128)-aligned tiles; tn is a multiple of 128 so output stores are
    # lane-dense (no masked vst).
    tm = min(tm_max, _round_up(N, 8))
    tn = min(tn_max, _round_up(M, 128))
    tm = _round_up(tm, 8)
    tn = _round_up(tn, 128)

    Np = _round_up(N, tm)
    Mp = _round_up(M, tn)
    if Np != N:
        x = jnp.pad(x, ((0, Np - N), (0, 0)))
    if Mp != M:
        y = jnp.pad(y, ((0, Mp - M), (0, 0)))
    # Zero-padded rows have zero norm -> scaled rows stay exactly zero, so the
    # padded region of the output is zero and is sliced off below.

    grid = (Np // tm, Mp // tn)
    out = pl.pallas_call(
        _make_cos_sim_kernel(temp),
        out_shape=jax.ShapeDtypeStruct((Np, Mp), jnp.float32),
        grid_spec=pltpu.PrefetchScalarGridSpec(
            num_scalar_prefetch=0,
            grid=grid,
            in_specs=[
                pl.BlockSpec((tm, H), lambda i, j: (i, 0)),
                pl.BlockSpec((tn, H), lambda i, j: (j, 0)),
            ],
            out_specs=pl.BlockSpec((tm, tn), lambda i, j: (i, j)),
        ),
        compiler_params=pltpu.CompilerParams(
            dimension_semantics=("parallel", "parallel"),
        ),
    )(x, y)
    return out[:N, :M]


def similarity_ref(x, y, temp):
    """Pure-JAX reference mirroring torch.nn.CosineSimilarity(dim=-1)(x, y)/temp."""
    if x.ndim == 3:
        x = x.reshape(x.shape[0], x.shape[-1])
        y = y.reshape(y.shape[1], y.shape[-1])
    x = x.astype(jnp.float32)
    y = y.astype(jnp.float32)
    dots = x @ y.T
    xn = jnp.maximum(jnp.linalg.norm(x, axis=-1, keepdims=True), _EPS)
    yn = jnp.maximum(jnp.linalg.norm(y, axis=-1, keepdims=True), _EPS)
    return dots / (xn * yn.T) / temp


if __name__ == "__main__":
    key = jax.random.PRNGKey(0)
    k1, k2 = jax.random.split(key)

    N, H = 8, 32            # batch of embeddings, hidden size (small demo)
    temp = 0.05             # SimCSE default temperature

    z1 = jax.random.normal(k1, (N, H), dtype=jnp.float32)
    z2 = jax.random.normal(k2, (N, H), dtype=jnp.float32)

    # SimCSE calling convention: sim(z1.unsqueeze(1), z2.unsqueeze(0))
    x = z1[:, None, :]      # (N, 1, H)
    y = z2[None, :, :]      # (1, N, H)

    out = similarity(x, y, temp)
    out = jax.block_until_ready(out)

    ref = similarity_ref(x, y, temp)
    assert out.shape == (N, N), out.shape
    assert jnp.allclose(out, ref, atol=1e-3, rtol=1e-3), float(
        jnp.max(jnp.abs(out - ref)))

    print("KERNEL_OK")
</pallas_src>

<mosaic_0001>
module attributes {stable_mosaic.version = 11 : i64} {
  func.func @cos_sim_kernel(%arg0: i32, %arg1: i32, %arg2: memref<8x32xf32, #tpu.memory_space<vmem>>, %arg3: memref<128x32xf32, #tpu.memory_space<vmem>>, %arg4: memref<8x128xf32, #tpu.memory_space<vmem>>) attributes {dimension_semantics = [#tpu.dimension_semantics<parallel>, #tpu.dimension_semantics<parallel>], iteration_bounds = array<i64: 1, 1>, scalar_prefetch = 0 : i64, scratch_operands = 0 : i64, tpu.core_type = #tpu.core_type<tc>, window_params = [{transform_indices = @transform_0, window_bounds = array<i64: 8, 32>}, {transform_indices = @transform_1, window_bounds = array<i64: 128, 32>}, {transform_indices = @transform_2, window_bounds = array<i64: 8, 128>}]} {
    %c0 = arith.constant 0 : index
    %c0_0 = arith.constant 0 : index
    %0 = vector.load %arg2[%c0, %c0_0] : memref<8x32xf32, #tpu.memory_space<vmem>>, vector<8x32xf32>
    %c0_1 = arith.constant 0 : index
    %c0_2 = arith.constant 0 : index
    %1 = vector.load %arg3[%c0_1, %c0_2] : memref<128x32xf32, #tpu.memory_space<vmem>>, vector<128x32xf32>
    %2 = arith.mulf %0, %0 : vector<8x32xf32>
    %cst = arith.constant dense<0.000000e+00> : vector<8xf32>
    %3 = vector.multi_reduction <add>, %2, %cst [1] : vector<8x32xf32> to vector<8xf32>
    %4 = vector.shape_cast %3 : vector<8xf32> to vector<8x1xf32>
    %cst_3 = arith.constant 1.000000e-16 : f32
    %5 = vector.broadcast %cst_3 : f32 to vector<8x1xf32>
    %6 = arith.maximumf %4, %5 : vector<8x1xf32>
    %7 = math.rsqrt %6 : vector<8x1xf32>
    %cst_4 = arith.constant 2.000000e+01 : f32
    %8 = vector.broadcast %cst_4 : f32 to vector<8x1xf32>
    %9 = arith.mulf %8, %7 : vector<8x1xf32>
    %10 = arith.mulf %1, %1 : vector<128x32xf32>
    %cst_5 = arith.constant dense<0.000000e+00> : vector<128xf32>
    %11 = vector.multi_reduction <add>, %10, %cst_5 [1] : vector<128x32xf32> to vector<128xf32>
    %12 = vector.shape_cast %11 : vector<128xf32> to vector<128x1xf32>
    %cst_6 = arith.constant 1.000000e-16 : f32
    %13 = vector.broadcast %cst_6 : f32 to vector<128x1xf32>
    %14 = arith.maximumf %12, %13 : vector<128x1xf32>
    %15 = math.rsqrt %14 : vector<128x1xf32>
    %16 = vector.broadcast %9 : vector<8x1xf32> to vector<8x32xf32>
    %17 = arith.mulf %0, %16 : vector<8x32xf32>
    %18 = vector.broadcast %15 : vector<128x1xf32> to vector<128x32xf32>
    %19 = arith.mulf %1, %18 : vector<128x32xf32>
    %cst_7 = arith.constant dense<0.000000e+00> : vector<8x128xf32>
    %20 = tpu.matmul %17, %19, %cst_7 {dimension_numbers = #tpu.dot_dimension_numbers<[1], [1], [0], [0], [0, 0, 1, 0], [], []>} : vector<8x32xf32>, vector<128x32xf32>, vector<8x128xf32> -> vector<8x128xf32>
    %c0_8 = arith.constant 0 : index
    %c0_9 = arith.constant 0 : index
    %21 = vector.load %arg4[%c0_8, %c0_9] : memref<8x128xf32, #tpu.memory_space<vmem>>, vector<8x128xf32>
    tpu.vector_store %arg4[%c0_8, %c0_9], %20 {strides = array<i32>} : memref<8x128xf32, #tpu.memory_space<vmem>>, vector<8x128xf32>,
    return
  }
  func.func @transform_0(%arg0: i32, %arg1: i32) -> (i32, i32) {
    %c0_i32 = arith.constant 0 : i32
    %c0_i32_0 = arith.constant 0 : i32
    return %arg0, %c0_i32 : i32, i32
  }
  func.func @transform_1(%arg0: i32, %arg1: i32) -> (i32, i32) {
    %c0_i32 = arith.constant 0 : i32
    %c0_i32_0 = arith.constant 0 : i32
    return %arg1, %c0_i32 : i32, i32
  }
  func.func @transform_2(%arg0: i32, %arg1: i32) -> (i32, i32) {
    %c0_i32 = arith.constant 0 : i32
    return %arg0, %arg1 : i32, i32
  }
}

</mosaic_0001>

<bundles_post_ra>
// kernel: tpu_custom_call.1
= control target key start
LH: loop header
LB: loop body
LE: loop exit
PB: predicated region body
PF: predicated region fallthrough
CT: control target
= control target key end

     0   :  { %vm30_vm0 = vcmask 261120   ;;  %s664_s0 = inlined_call_operand.vmem [shape: f32[8,32], index: 0, kind: input, shape index: {}]   ;;  %s665_s1 = inlined_call_operand.vmem [shape: f32[128,32], index: 1, kind: input, shape index: {}]   ;;  %s666_s2 = inlined_call_operand.hbm [shape: f32[8,128], index: 2, kind: output, shape index: {}]  }
   0x1   :  { %v471_v0 = vld [vmem:[%s665_s1] sm:$0xff]  ;;  %v476_v1 = vld [vmem:[%s665_s1 + $0x10] sm:$0xff]  ;;  %v481_v2 = vld [vmem:[%s665_s1 + $0x8] sm:$0xff] }
   0x2   :  { %v37_v3 = vmul.f32 %v471_v0, %v471_v0  ;;  %v39_v4 = vmul.f32 %v476_v1, %v476_v1  ;;  %v38_v5 = vmul.f32 %v481_v2, %v481_v2  ;;  %v492_v6 = vld [vmem:[%s665_s1 + $0x18] sm:$0xff]  ;;  %v499_v8 = vld [vmem:[%s665_s1 + $0x28] sm:$0xff]  ;;  %v504_v9 = vld [vmem:[%s665_s1 + $0x20] sm:$0xff] }
   0x3   :  { %v40_v7 = vmul.f32 %v492_v6, %v492_v6  ;;  %v42_v14 = vmul.f32 %v499_v8, %v499_v8  ;;  %v41_v15 = vmul.f32 %v504_v9, %v504_v9 }
   0x4   :  { %v53_v10 = vsel %vm30_vm0, %v37_v3, 0.0  ;;  %v59_v11 = vsel %vm30_vm0, %v39_v4, 0.0  ;;  %v56_v12 = vsel %vm30_vm0, %v38_v5, 0.0 }
   0x5   :  { %54 = vadd.xlane.f32.xlu0 %v53_v10  ;;  %60 = vadd.xlane.f32.xlu1 %v59_v11  ;;  %v62_v13 = vsel %vm30_vm0, %v40_v7, 0.0 }
   0x6   :  { %7 = vsyncpa [#allocation3], 0  ;;  %v517_v16 = vld [vmem:[%s665_s1 + $0x38] sm:$0xff]  ;;  %v522_v17 = vld [vmem:[%s665_s1 + $0x30] sm:$0xff]  ;;  %v68_v18 = vsel %vm30_vm0, %v42_v14, 0.0  ;;  %v65_v19 = vsel %vm30_vm0, %v41_v15, 0.0 }
   0x7   :  { %v44_v20 = vmul.f32 %v517_v16, %v517_v16  ;;  %v43_v21 = vmul.f32 %v522_v17, %v522_v17  ;;  %v533_v22 = vld [vmem:[%s665_s1 + $0x48] sm:$0xff]  ;;  %v538_v23 = vld [vmem:[%s665_s1 + $0x40] sm:$0xff]  ;;  %v549_v28 = vld [vmem:[%s665_s1 + $0x58] sm:$0xff]  ;;  %v449_v50 = vmov 0.0|0.0   ;;  %vm450_vm1 = vmmov 0  }
   0x8   :  { %v46_v26 = vmul.f32 %v533_v22, %v533_v22  ;;  %v45_v27 = vmul.f32 %v538_v23, %v538_v23  ;;  %v554_v29 = vld [vmem:[%s665_s1 + $0x50] sm:$0xff]  ;;  %v48_v32 = vmul.f32 %v549_v28, %v549_v28  ;;  %v565_v34 = vld [vmem:[%s665_s1 + $0x68] sm:$0xff]  ;;  %v570_v35 = vld [vmem:[%s665_s1 + $0x60] sm:$0xff]  ;;  %355 = vmatprep.subr.bf16.mxu0 %v449_v50  ;;  %v451_v52 = vmov 0.0  }
   0x9   :  { %57 = vadd.xlane.f32.xlu0 %v56_v12  ;;  %63 = vadd.xlane.f32.xlu1 %v62_v13  ;;  %v74_v24 = vsel %vm30_vm0, %v44_v20, 0.0  ;;  %v71_v25 = vsel %vm30_vm0, %v43_v21, 0.0  ;;  %v47_v33 = vmul.f32 %v554_v29, %v554_v29  ;;  %v50_v38 = vmul.f32 %v565_v34, %v565_v34  ;;  %v581_v40 = vld [vmem:[%s665_s1 + $0x78] sm:$0xff]  ;;  %v586_v41 = vld [vmem:[%s665_s1 + $0x70] sm:$0xff]  ;;  %v597_v46 = vld [vmem:[%s664_s0] sm:$0xff]  ;;  %s452_s0 = smov [#allocation2]  }
   0xa   :  { %v80_v30 = vsel %vm30_vm0, %v46_v26, 0.0  ;;  %v77_v31 = vsel %vm30_vm0, %v45_v27, 0.0  ;;  %v86_v36 = vsel %vm30_vm0, %v48_v32, 0.0  ;;  %v49_v39 = vmul.f32 %v570_v35, %v570_v35  ;;  %352 = vmatprep.mubr.msk.f32.mxu0 %vm450_vm1, %v451_v52  ;;  %vm609_vm2 = vmpackc.low %vm30_vm0, %vm30_vm0  ;;  %s278_s1 = sshll.u32 %s452_s0, 4  ;;  %s279_s1 = int_to_ptr.vmem [resolvable:$true] %s278_s1 }
   0xb   :  { %v83_v37 = vsel %vm30_vm0, %v47_v33, 0.0  ;;  %v92_v42 = vsel %vm30_vm0, %v50_v38, 0.0  ;;  %v52_v44 = vmul.f32 %v581_v40, %v581_v40  ;;  %v51_v45 = vmul.f32 %v586_v41, %v586_v41  ;;  %s425_s15 = scalar_lea.vmem %s279_s1, 128  ;;  %p430_p1 = scmp.lt.s32.totalorder %s279_s1, %s279_s1 }
   0xc   :  { %v89_v43 = vsel %vm30_vm0, %v49_v39, 0.0  ;;  %v29_v49 = vmul.f32 %v597_v46, %v597_v46  ;;  %p426_p0 = scmp.ne.s32.totalorder %s279_s1, %s425_s15  ;;  %p431_p2 = scmp.lt.s32.totalorder %s425_s15, %s425_s15 }
   0xd   :  { %69 = vadd.xlane.f32.xlu1 %v68_v18  ;;  %66 = vadd.xlane.f32.xlu0 %v65_v19  ;;  %v98_v47 = vsel %vm30_vm0, %v52_v44, 0.0  ;;  %v95_v48 = vsel %vm30_vm0, %v51_v45, 0.0 }
   0xe   :  { %v31_v51 = vsel %vm30_vm0, %v29_v49, 0.0  ;;  %p432_p3 = por %p431_p2, %p430_p1 }
  0x10   :  { %p433_p4 = pnand %p432_p3, %p426_p0 }
  0x11   :  { %75 = vadd.xlane.f32.xlu1 %v74_v24  ;;  %72 = vadd.xlane.f32.xlu0 %v71_v25 }
  0x15   :  { %81 = vadd.xlane.f32.xlu1 %v80_v30  ;;  %78 = vadd.xlane.f32.xlu0 %v77_v31 }
  0x19   :  { %87 = vadd.xlane.f32.xlu1 %v86_v36  ;;  %84 = vadd.xlane.f32.xlu0 %v83_v37 }
  0x1d   :  { %93 = vadd.xlane.f32.xlu1 %v92_v42  ;;  %90 = vadd.xlane.f32.xlu0 %v89_v43 }
  0x21   :  { %99 = vadd.xlane.f32.xlu1 %v98_v47  ;;  %96 = vadd.xlane.f32.xlu0 %v95_v48 }
  0x25   :  { %32 = vadd.xlane.f32.xlu0 %v31_v51 }
  0x92   :  { %v55_v53 = vpop.xlane.xlu0 %54  ;;  %v61_v54 = vpop.xlane.xlu1 %60 }
  0x93   :  { %v101_v55 = vmax.f32 %v55_v53, 1e-16  ;;  %v103_v59 = vmax.f32 %v61_v54, 1e-16 }
  0x95   :  { %391 = vrsqrt.f32 %v101_v55 }
  0x96   :  { %v58_v56 = vpop.xlane.xlu0 %57  ;;  %v64_v57 = vpop.xlane.xlu1 %63 }
  0x97   :  { %v102_v58 = vmax.f32 %v58_v56, 1e-16  ;;  %v104_v60 = vmax.f32 %v64_v57, 1e-16 }
  0x99   :  { %393 = vrsqrt.f32 %v102_v58 }
  0x9a   :  { %v70_v61 = vpop.xlane.xlu1 %69  ;;  %395 = vrsqrt.f32 %v103_v59  ;;  %v67_v62 = vpop.xlane.xlu0 %66 }
  0x9b   :  { %397 = vrsqrt.f32 %v104_v60  ;;  %v106_v63 = vmax.f32 %v70_v61, 1e-16  ;;  %v105_v3 = vmax.f32 %v67_v62, 1e-16 }
  0x9d   :  { %399 = vrsqrt.f32 %v106_v63 }
  0x9e   :  { %401 = vrsqrt.f32 %v105_v3  ;;  %v76_v7 = vpop.xlane.xlu1 %75  ;;  %v73_v12 = vpop.xlane.xlu0 %72 }
  0x9f   :  { %v392_v4 = vpop.eup %391  ;;  %v108_v18 = vmax.f32 %v76_v7, 1e-16  ;;  %v107_v20 = vmax.f32 %v73_v12, 1e-16 }
  0xa0   :  { %v134_v10 = vmul.f32 %v392_v4, %v471_v0 }
  0xa1   :  { %403 = vrsqrt.f32 %v108_v18 }
  0xa2   :  { %405 = vrsqrt.f32 %v107_v20  ;;  %v82_v21 = vpop.xlane.xlu1 %81  ;;  %v79_v25 = vpop.xlane.xlu0 %78 }
  0xa3   :  { %v394_v5 = vpop.eup %393  ;;  %v110_v30 = vmax.f32 %v82_v21, 1e-16  ;;  %v109_v31 = vmax.f32 %v79_v25, 1e-16 }
  0xa4   :  { %v135_v11 = vmul.f32 %v394_v5, %v481_v2  ;;  %v396_v14 = vpop.eup %395 }
  0xa5   :  { %v398_v19 = vpop.eup %397  ;;  %v136_v0 = vmul.f32 %v396_v14, %v476_v1  ;;  %407 = vrsqrt.f32 %v110_v30 }
  0xa6   :  { %v356_v15 = vpack.c.bf16 %v135_v11, %v134_v10  ;;  %v137_v2 = vmul.f32 %v398_v19, %v492_v6  ;;  %409 = vrsqrt.f32 %v109_v31  ;;  %v88_v1 = vpop.xlane.xlu1 %87  ;;  %v85_v37 = vpop.xlane.xlu0 %84 }
  0xa7   :  { %v400_v24 = vpop.eup %399  ;;  %v112_v39 = vmax.f32 %v88_v1, 1e-16  ;;  %v111_v42 = vmax.f32 %v85_v37, 1e-16 }
  0xa8   :  { %358 = vmatpush3.bf16.xpose.msk.msra.mxu0 %vm609_vm2, %v356_v15  ;;  %v402_v26 = vpop.eup %401  ;;  %v360_v27 = vpack.c.bf16 %v137_v2, %v136_v0  ;;  %v139_v33 = vmul.f32 %v400_v24, %v499_v8 }
  0xa9   :  { %359 = vmatprep.subr.bf16.mxu0 %v449_v50  ;;  %v138_v32 = vmul.f32 %v402_v26, %v504_v9  ;;  %411 = vrsqrt.f32 %v112_v39 }
  0xaa   :  { %413 = vrsqrt.f32 %v111_v42  ;;  %v94_v8 = vpop.xlane.xlu1 %93  ;;  %v91_v47 = vpop.xlane.xlu0 %90 }
  0xab   :  { %v404_v6 = vpop.eup %403  ;;  %v364_v36 = vpack.c.bf16 %v139_v33, %v138_v32  ;;  %v114_v49 = vmax.f32 %v94_v8, 1e-16  ;;  %v113_v51 = vmax.f32 %v91_v47, 1e-16 }
  0xac   :  { %v406_v38 = vpop.eup %405  ;;  %v141_v9 = vmul.f32 %v404_v6, %v517_v16 }
  0xad   :  { %v140_v43 = vmul.f32 %v406_v38, %v522_v17  ;;  %415 = vrsqrt.f32 %v114_v49 }
  0xae   :  { %417 = vrsqrt.f32 %v113_v51  ;;  %v100_v16 = vpop.xlane.xlu1 %99  ;;  %v97_v55 = vpop.xlane.xlu0 %96 }
  0xaf   :  { %v408_v44 = vpop.eup %407  ;;  %v368_v45 = vpack.c.bf16 %v141_v9, %v140_v43  ;;  %v116_v57 = vmax.f32 %v100_v16, 1e-16  ;;  %v115_v58 = vmax.f32 %v97_v55, 1e-16 }
  0xb0   :  { %362 = vmatpush3.bf16.xpose.msk.msra.mxu0 %vm609_vm2, %v360_v27  ;;  %v410_v48 = vpop.eup %409  ;;  %v143_v17 = vmul.f32 %v408_v44, %v533_v22 }
  0xb1   :  { %363 = vmatprep.subr.bf16.mxu0 %v449_v50  ;;  %v142_v52 = vmul.f32 %v410_v48, %v538_v23  ;;  %419 = vrsqrt.f32 %v116_v57 }
  0xb2   :  { %421 = vrsqrt.f32 %v115_v58  ;;  %v33_v22 = vpop.xlane.xlu0 %32 }
  0xb3   :  { %v412_v53 = vpop.eup %411  ;;  %v372_v54 = vpack.c.bf16 %v143_v17, %v142_v52  ;;  %v34_v63 = vmax.f32 %v33_v22, 1e-16 }
  0xb4   :  { %v414_v56 = vpop.eup %413  ;;  %v145_v23 = vmul.f32 %v412_v53, %v549_v28 }
  0xb5   :  { %v144_v59 = vmul.f32 %v414_v56, %v554_v29  ;;  %423 = vrsqrt.f32 %v34_v63 }
  0xb7   :  { %v416_v60 = vpop.eup %415  ;;  %v376_v61 = vpack.c.bf16 %v145_v23, %v144_v59 }
  0xb8   :  { %366 = vmatpush3.bf16.xpose.msk.msra.mxu0 %vm609_vm2, %v364_v36  ;;  %v418_v62 = vpop.eup %417  ;;  %v147_v4 = vmul.f32 %v416_v60, %v565_v34 }
  0xb9   :  { %367 = vmatprep.subr.bf16.mxu0 %v449_v50  ;;  %v146_v3 = vmul.f32 %v418_v62, %v570_v35 }
  0xbb   :  { %v420_v28 = vpop.eup %419  ;;  %v380_v29 = vpack.c.bf16 %v147_v4, %v146_v3 }
  0xbc   :  { %v422_v5 = vpop.eup %421  ;;  %v149_v10 = vmul.f32 %v420_v28, %v581_v40 }
  0xbd   :  { %v148_v7 = vmul.f32 %v422_v5, %v586_v41 }
  0xbf   :  { %v424_v11 = vpop.eup %423  ;;  %v384_v12 = vpack.c.bf16 %v149_v10, %v148_v7 }
  0xc0   :  { %370 = vmatpush3.bf16.xpose.msk.msra.mxu0 %vm609_vm2, %v368_v45  ;;  %v36_v35 = vmul.f32 20.0, %v424_v11 }
  0xc1   :  { %371 = vmatprep.subr.bf16.mxu0 %v449_v50 }
  0xc2   :  { %v133_v34 = vmul.f32 %v36_v35, %v597_v46 }
  0xc8   :  { %374 = vmatpush3.bf16.xpose.msk.msra.mxu0 %vm609_vm2, %v372_v54 }
  0xc9   :  { %375 = vmatprep.subr.bf16.mxu0 %v449_v50 }
  0xd0   :  { %378 = vmatpush3.bf16.xpose.msk.msra.mxu0 %vm609_vm2, %v376_v61 }
  0xd1   :  { %379 = vmatprep.subr.bf16.mxu0 %v449_v50 }
  0xd8   :  { %382 = vmatpush3.bf16.xpose.msk.msra.mxu0 %vm609_vm2, %v380_v29 }
  0xd9   :  { %383 = vmatprep.subr.bf16.mxu0 %v449_v50 }
  0xe0   :  { %386 = vmatpush3.bf16.xpose.msk.msra.mxu0 %vm609_vm2, %v384_v12 }
  0xe7   :  { %353 = vmatmul.mubr.msk.f32.vlgmr.msra.gmra.mrb[0].mxu0 %vm30_vm0, %v133_v34 }
 0x1ba   :  { %v267_v14 = vpop.f32.mrb[0].mxu0 }
 0x1bb   :  { %271 = vst [vmem:[#allocation2] sm:$0xff] %v267_v14  ;;  %v354_v41 = vpop.f32.mrb[1].mxu0 }
 0x1bc   :  { %436 = shalt.err (!%p433_p4)
}
 0x1bd   :  { %s437_s18 = scalar_lea.hbm %s666_s2, 128 }
 0x1be   :  { %p438_p5 = scmp.ne.s32.totalorder %s666_s2, %s437_s18  ;;  %p441_p6 = scmp.lt.u32.totalorder %s437_s18, %s666_s2 }
 0x1c0   :  { %p443_p7 = pnand %p441_p6, %p438_p5 }
 0x1c2   :  { %446 = shalt.err (!%p443_p7)
}
 0x1c3   :  { %281 = dma.vmem_to_hbm [thread:$0]  %s279_s1, 128, %s666_s2, [#allocation3]  }
 0x1c4   :  { %447 = dma.done.wait [#allocation3], 128  }
 0x1c5   :  { %448 = vsyncadd [#allocation3], 4294967168 }
 0x1c6   :  { %285 = vsyncpa [#allocation3], 1 }

</bundles_post_ra>
